<compile_context>
chip_gen: v6e
topology: v6e:2x2x1
jax: 0.10.0
libtpu: 0.0.40
codegen_flags: <defaults>
</compile_context>

<pallas_src>
import functools

import jax
import jax.numpy as jnp
from jax.experimental import pallas as pl
from jax.experimental.pallas import tpu as pltpu

NEG_SLOPE = 0.01  # nn.LeakyReLU default


def _leaky_relu(v):
    return jnp.where(v >= 0, v, NEG_SLOPE * v)


def lifestyle_nn_kernel(x_ref,
                        w1_ref, b1_ref,
                        w2_ref, b2_ref,
                        w3_ref, b3_ref,
                        w4_ref, b4_ref,
                        out_ref):
    # bf16 MXU inputs, f32 accumulation; bias add / activation / softmax in f32.
    x = x_ref[...].astype(jnp.bfloat16)

    # fc1 -> LeakyReLU
    h = jnp.dot(x, w1_ref[...], preferred_element_type=jnp.float32) + b1_ref[...]
    h = _leaky_relu(h).astype(jnp.bfloat16)

    # fc2 -> LeakyReLU
    h = jnp.dot(h, w2_ref[...], preferred_element_type=jnp.float32) + b2_ref[...]
    h = _leaky_relu(h).astype(jnp.bfloat16)

    # fc3 (zero-padded to 128 cols -> lane-dense) -> LeakyReLU -> dropout (identity, eval)
    h = jnp.dot(h, w3_ref[...], preferred_element_type=jnp.float32) + b3_ref[...]
    h = _leaky_relu(h).astype(jnp.bfloat16)
    # TODO(synk): training-mode Dropout(p=0.4) (Bernoulli mask + 1/(1-p) scale) omitted; eval forward is identity.

    # fc4 padded to a lane-dense 128-wide output; padded columns carry a huge
    # negative bias so exp() -> 0 and the normalization over real classes is
    # unchanged. Softmax runs 128-wide in vregs; only the real columns are
    # stored to HBM.
    logits = jnp.dot(h, w4_ref[...], preferred_element_type=jnp.float32) + b4_ref[...]
    m = jnp.max(logits, axis=1, keepdims=True)
    e = jnp.exp(logits - m)
    denom = jnp.sum(e, axis=1, keepdims=True)
    probs = e / denom  # exact reciprocal: rows sum to 1 to f32 precision
    out_ref[...] = probs[:, :out_ref.shape[1]].astype(out_ref.dtype)


@functools.partial(jax.jit, static_argnames=("tile_b",))
def lifestyle_nn_forward(x, params, *, tile_b=2048):
    """x: (B, input_size) float32. params: dict of (in, out) weights and (1, out) biases."""
    B, F = x.shape
    num_classes = params["w4"].shape[1]
    h3_pad = 128                                  # lane-dense fc3 width
    n_pad = ((num_classes + 127) // 128) * 128    # lane-dense fc4 width (in vregs only)

    # --- weight prep (all tiny; done once under jit) ---
    # fc3: zero-pad output columns 64 -> 128 (LeakyReLU(0)=0 keeps them inert).
    w3p = jnp.zeros((params["w3"].shape[0], h3_pad), jnp.float32)
    w3p = w3p.at[:, :params["w3"].shape[1]].set(params["w3"])
    b3p = jnp.zeros((1, h3_pad), jnp.float32)
    b3p = b3p.at[:, :params["b3"].shape[1]].set(params["b3"])

    # fc4: zero-pad input rows 64 -> 128 and output cols to n_pad; padded output
    # columns get a huge negative bias so softmax drives them to exactly 0.
    w4p = jnp.zeros((h3_pad, n_pad), jnp.float32)
    w4p = w4p.at[:params["w4"].shape[0], :num_classes].set(params["w4"])
    b4p = jnp.full((1, n_pad), -1e30, jnp.float32)
    b4p = b4p.at[:, :num_classes].set(params["b4"])

    # bf16 weights (halves weight DMA / VMEM); biases stay f32.
    w1 = params["w1"].astype(jnp.bfloat16)
    w2 = params["w2"].astype(jnp.bfloat16)
    w3 = w3p.astype(jnp.bfloat16)
    w4 = w4p.astype(jnp.bfloat16)
    b1, b2, b3, b4 = params["b1"], params["b2"], b3p, b4p

    # --- batch tiling ---
    # tb: multiple of 8 sublanes, capped at the (sublane-rounded) batch.
    b_up8 = max(8, ((B + 7) // 8) * 8)
    tb = max(8, (min(int(tile_b), b_up8) // 8) * 8)
    # Keep >=2 grid steps when the batch allows so v7x can shard the
    # "parallel" batch axis across its 2 TensorCores.
    if b_up8 >= 16 and 2 * tb > b_up8:
        tb = max(8, ((-(-B // 2) + 7) // 8) * 8)
    n_tiles = -(-B // tb)  # ceil; Pallas handles the ragged last block (no jnp.pad)
    grid = (n_tiles,)

    weight_args = (w1, b1, w2, b2, w3, b3, w4, b4)

    def resident_spec(a):
        # Whole-array block, same block every grid step -> stays in VMEM (no re-DMA).
        return pl.BlockSpec(a.shape, lambda i: (0, 0))

    in_specs = [pl.BlockSpec((tb, F), lambda i: (i, 0))]  # x: tiled over batch
    in_specs += [resident_spec(a) for a in weight_args]

    rows = n_tiles * tb
    flops = 2 * rows * (F * 256 + 256 * 128 + 128 * h3_pad + h3_pad * n_pad)
    bytes_accessed = (B * F * 4 + B * num_classes * 4
                      + sum(int(a.size) * a.dtype.itemsize for a in weight_args))
    cost = pl.CostEstimate(flops=flops,
                           transcendentals=rows * n_pad,
                           bytes_accessed=bytes_accessed)

    out = pl.pallas_call(
        lifestyle_nn_kernel,
        out_shape=jax.ShapeDtypeStruct((B, num_classes), jnp.float32),
        grid=grid,
        in_specs=in_specs,
        out_specs=pl.BlockSpec((tb, num_classes), lambda i: (i, 0)),
        compiler_params=pltpu.CompilerParams(
            dimension_semantics=("parallel",),
            vmem_limit_bytes=32 * 1024 * 1024,
        ),
        cost_estimate=cost,
    )(x, *weight_args)

    return out


def init_params(key, input_size, num_classes):
    """Deterministic init mimicking nn.Linear (uniform +/- 1/sqrt(fan_in))."""
    dims = [(input_size, 256), (256, 128), (128, 64), (64, num_classes)]
    params = {}
    for i, (fan_in, fan_out) in enumerate(dims, start=1):
        key, kw, kb = jax.random.split(key, 3)
        bound = 1.0 / jnp.sqrt(jnp.float32(fan_in))
        params[f"w{i}"] = jax.random.uniform(
            kw, (fan_in, fan_out), jnp.float32, -bound, bound)
        params[f"b{i}"] = jax.random.uniform(
            kb, (1, fan_out), jnp.float32, -bound, bound)
    return params


def reference_forward(x, params):
    """Pure-JAX f32 eval-mode reference."""
    h = _leaky_relu(x @ params["w1"] + params["b1"])
    h = _leaky_relu(h @ params["w2"] + params["b2"])
    h = _leaky_relu(h @ params["w3"] + params["b3"])
    logits = h @ params["w4"] + params["b4"]
    return jax.nn.softmax(logits, axis=1)


if __name__ == "__main__":
    key = jax.random.PRNGKey(0)
    key, kx = jax.random.split(key)

    batch = 8
    input_size = 32
    num_classes = 8

    x = jax.random.normal(kx, (batch, input_size), jnp.float32)
    params = init_params(key, input_size, num_classes)

    out = lifestyle_nn_forward(x, params)
    out = jax.block_until_ready(out)

    assert out.shape == (batch, num_classes)

    # Sanity: softmax rows sum to ~1 (exact reciprocal -> f32 precision).
    row_sums = jnp.sum(out, axis=1)
    assert bool(jnp.all(jnp.abs(row_sums - 1.0) < 1e-3)), row_sums

    # Compare against the pure-f32 reference (bf16 weight/activation cast => loose tol).
    ref = reference_forward(x, params)
    max_err = float(jnp.max(jnp.abs(out - ref)))
    assert max_err < 5e-2, max_err

    print("KERNEL_OK")
</pallas_src>

<mosaic_0001>
module attributes {stable_mosaic.version = 11 : i64} {
  func.func @lifestyle_nn_kernel(%arg0: i32, %arg1: memref<8x32xf32, #tpu.memory_space<vmem>>, %arg2: memref<32x256xbf16, #tpu.memory_space<vmem>>, %arg3: memref<1x256xf32, #tpu.memory_space<vmem>>, %arg4: memref<256x128xbf16, #tpu.memory_space<vmem>>, %arg5: memref<1x128xf32, #tpu.memory_space<vmem>>, %arg6: memref<128x128xbf16, #tpu.memory_space<vmem>>, %arg7: memref<1x128xf32, #tpu.memory_space<vmem>>, %arg8: memref<128x128xbf16, #tpu.memory_space<vmem>>, %arg9: memref<1x128xf32, #tpu.memory_space<vmem>>, %arg10: memref<8x8xf32, #tpu.memory_space<vmem>>) attributes {dimension_semantics = [#tpu.dimension_semantics<parallel>], iteration_bounds = array<i64: 1>, scalar_prefetch = 0 : i64, scratch_operands = 0 : i64, tpu.core_type = #tpu.core_type<tc>, window_params = [{transform_indices = @transform_0, window_bounds = array<i64: 8, 32>}, {pipeline_mode = #tpu.pipeline_mode<synchronous>, transform_indices = @transform_1, window_bounds = array<i64: 32, 256>}, {pipeline_mode = #tpu.pipeline_mode<synchronous>, transform_indices = @transform_2, window_bounds = array<i64: 1, 256>}, {pipeline_mode = #tpu.pipeline_mode<synchronous>, transform_indices = @transform_3, window_bounds = array<i64: 256, 128>}, {pipeline_mode = #tpu.pipeline_mode<synchronous>, transform_indices = @transform_4, window_bounds = array<i64: 1, 128>}, {pipeline_mode = #tpu.pipeline_mode<synchronous>, transform_indices = @transform_5, window_bounds = array<i64: 128, 128>}, {pipeline_mode = #tpu.pipeline_mode<synchronous>, transform_indices = @transform_6, window_bounds = array<i64: 1, 128>}, {pipeline_mode = #tpu.pipeline_mode<synchronous>, transform_indices = @transform_7, window_bounds = array<i64: 128, 128>}, {pipeline_mode = #tpu.pipeline_mode<synchronous>, transform_indices = @transform_8, window_bounds = array<i64: 1, 128>}, {transform_indices = @transform_9, window_bounds = array<i64: 8, 8>}]} {
    %c0 = arith.constant 0 : index
    %c0_0 = arith.constant 0 : index
    %0 = vector.load %arg1[%c0, %c0_0] : memref<8x32xf32, #tpu.memory_space<vmem>>, vector<8x32xf32>
    %1 = arith.truncf %0 : vector<8x32xf32> to vector<8x32xbf16>
    %c0_1 = arith.constant 0 : index
    %c0_2 = arith.constant 0 : index
    %2 = vector.load %arg2[%c0_1, %c0_2] : memref<32x256xbf16, #tpu.memory_space<vmem>>, vector<32x256xbf16>
    %cst = arith.constant dense<0.000000e+00> : vector<8x256xf32>
    %3 = tpu.matmul %1, %2, %cst {dimension_numbers = #tpu.dot_dimension_numbers<[1], [0], [0], [1], [0, 0, 1, 1], [], []>} : vector<8x32xbf16>, vector<32x256xbf16>, vector<8x256xf32> -> vector<8x256xf32>
    %c0_3 = arith.constant 0 : index
    %c0_4 = arith.constant 0 : index
    %4 = vector.load %arg3[%c0_3, %c0_4] : memref<1x256xf32, #tpu.memory_space<vmem>>, vector<1x256xf32>
    %5 = vector.broadcast %4 : vector<1x256xf32> to vector<8x256xf32>
    %6 = arith.addf %3, %5 : vector<8x256xf32>
    %cst_5 = arith.constant 0.000000e+00 : f32
    %7 = vector.broadcast %cst_5 : f32 to vector<8x256xf32>
    %8 = arith.cmpf oge, %6, %7 : vector<8x256xf32>
    %cst_6 = arith.constant 0.00999999977 : f32
    %9 = vector.broadcast %cst_6 : f32 to vector<8x256xf32>
    %10 = arith.mulf %9, %6 : vector<8x256xf32>
    %11 = arith.select %8, %6, %10 : vector<8x256xi1>, vector<8x256xf32>
    %12 = arith.truncf %11 : vector<8x256xf32> to vector<8x256xbf16>
    %c0_7 = arith.constant 0 : index
    %c0_8 = arith.constant 0 : index
    %13 = vector.load %arg4[%c0_7, %c0_8] : memref<256x128xbf16, #tpu.memory_space<vmem>>, vector<256x128xbf16>
    %cst_9 = arith.constant dense<0.000000e+00> : vector<8x128xf32>
    %14 = tpu.matmul %12, %13, %cst_9 {dimension_numbers = #tpu.dot_dimension_numbers<[1], [0], [0], [1], [0, 0, 1, 1], [], []>} : vector<8x256xbf16>, vector<256x128xbf16>, vector<8x128xf32> -> vector<8x128xf32>
    %c0_10 = arith.constant 0 : index
    %c0_11 = arith.constant 0 : index
    %15 = vector.load %arg5[%c0_10, %c0_11] : memref<1x128xf32, #tpu.memory_space<vmem>>, vector<1x128xf32>
    %16 = vector.broadcast %15 : vector<1x128xf32> to vector<8x128xf32>
    %17 = arith.addf %14, %16 : vector<8x128xf32>
    %cst_12 = arith.constant 0.000000e+00 : f32
    %18 = vector.broadcast %cst_12 : f32 to vector<8x128xf32>
    %19 = arith.cmpf oge, %17, %18 : vector<8x128xf32>
    %cst_13 = arith.constant 0.00999999977 : f32
    %20 = vector.broadcast %cst_13 : f32 to vector<8x128xf32>
    %21 = arith.mulf %20, %17 : vector<8x128xf32>
    %22 = arith.select %19, %17, %21 : vector<8x128xi1>, vector<8x128xf32>
    %23 = arith.truncf %22 : vector<8x128xf32> to vector<8x128xbf16>
    %c0_14 = arith.constant 0 : index
    %c0_15 = arith.constant 0 : index
    %24 = vector.load %arg6[%c0_14, %c0_15] : memref<128x128xbf16, #tpu.memory_space<vmem>>, vector<128x128xbf16>
    %cst_16 = arith.constant dense<0.000000e+00> : vector<8x128xf32>
    %25 = tpu.matmul %23, %24, %cst_16 {dimension_numbers = #tpu.dot_dimension_numbers<[1], [0], [0], [1], [0, 0, 1, 1], [], []>} : vector<8x128xbf16>, vector<128x128xbf16>, vector<8x128xf32> -> vector<8x128xf32>
    %c0_17 = arith.constant 0 : index
    %c0_18 = arith.constant 0 : index
    %26 = vector.load %arg7[%c0_17, %c0_18] : memref<1x128xf32, #tpu.memory_space<vmem>>, vector<1x128xf32>
    %27 = vector.broadcast %26 : vector<1x128xf32> to vector<8x128xf32>
    %28 = arith.addf %25, %27 : vector<8x128xf32>
    %cst_19 = arith.constant 0.000000e+00 : f32
    %29 = vector.broadcast %cst_19 : f32 to vector<8x128xf32>
    %30 = arith.cmpf oge, %28, %29 : vector<8x128xf32>
    %cst_20 = arith.constant 0.00999999977 : f32
    %31 = vector.broadcast %cst_20 : f32 to vector<8x128xf32>
    %32 = arith.mulf %31, %28 : vector<8x128xf32>
    %33 = arith.select %30, %28, %32 : vector<8x128xi1>, vector<8x128xf32>
    %34 = arith.truncf %33 : vector<8x128xf32> to vector<8x128xbf16>
    %c0_21 = arith.constant 0 : index
    %c0_22 = arith.constant 0 : index
    %35 = vector.load %arg8[%c0_21, %c0_22] : memref<128x128xbf16, #tpu.memory_space<vmem>>, vector<128x128xbf16>
    %cst_23 = arith.constant dense<0.000000e+00> : vector<8x128xf32>
    %36 = tpu.matmul %34, %35, %cst_23 {dimension_numbers = #tpu.dot_dimension_numbers<[1], [0], [0], [1], [0, 0, 1, 1], [], []>} : vector<8x128xbf16>, vector<128x128xbf16>, vector<8x128xf32> -> vector<8x128xf32>
    %c0_24 = arith.constant 0 : index
    %c0_25 = arith.constant 0 : index
    %37 = vector.load %arg9[%c0_24, %c0_25] : memref<1x128xf32, #tpu.memory_space<vmem>>, vector<1x128xf32>
    %38 = vector.broadcast %37 : vector<1x128xf32> to vector<8x128xf32>
    %39 = arith.addf %36, %38 : vector<8x128xf32>
    %cst_26 = arith.constant dense<0xFF800000> : vector<8xf32>
    %40 = vector.multi_reduction <maximumf>, %39, %cst_26 [1] : vector<8x128xf32> to vector<8xf32>
    %41 = vector.shape_cast %40 : vector<8xf32> to vector<8x1xf32>
    %42 = vector.broadcast %41 : vector<8x1xf32> to vector<8x128xf32>
    %43 = arith.subf %39, %42 : vector<8x128xf32>
    %44 = math.exp %43 : vector<8x128xf32>
    %cst_27 = arith.constant dense<0.000000e+00> : vector<8xf32>
    %45 = vector.multi_reduction <add>, %44, %cst_27 [1] : vector<8x128xf32> to vector<8xf32>
    %46 = vector.shape_cast %45 : vector<8xf32> to vector<8x1xf32>
    %47 = vector.broadcast %46 : vector<8x1xf32> to vector<8x128xf32>
    %48 = arith.divf %44, %47 : vector<8x128xf32>
    %49 = vector.extract_strided_slice %48 {offsets = [0, 0], sizes = [8, 8], strides = [1, 1]} : vector<8x128xf32> to vector<8x8xf32>
    %c0_28 = arith.constant 0 : index
    %c0_29 = arith.constant 0 : index
    %50 = vector.load %arg10[%c0_28, %c0_29] : memref<8x8xf32, #tpu.memory_space<vmem>>, vector<8x8xf32>
    tpu.vector_store %arg10[%c0_28, %c0_29], %49 {strides = array<i32>} : memref<8x8xf32, #tpu.memory_space<vmem>>, vector<8x8xf32>,
    return
  }
  func.func @transform_0(%arg0: i32) -> (i32, i32) {
    %c0_i32 = arith.constant 0 : i32
    %c0_i32_0 = arith.constant 0 : i32
    return %arg0, %c0_i32 : i32, i32
  }
  func.func @transform_1(%arg0: i32) -> (i32, i32) {
    %c0_i32 = arith.constant 0 : i32
    %c0_i32_0 = arith.constant 0 : i32
    %c0_i32_1 = arith.constant 0 : i32
    return %c0_i32, %c0_i32_0 : i32, i32
  }
  func.func @transform_2(%arg0: i32) -> (i32, i32) {
    %c0_i32 = arith.constant 0 : i32
    %c0_i32_0 = arith.constant 0 : i32
    %c0_i32_1 = arith.constant 0 : i32
    return %c0_i32, %c0_i32_0 : i32, i32
  }
  func.func @transform_3(%arg0: i32) -> (i32, i32) {
    %c0_i32 = arith.constant 0 : i32
    %c0_i32_0 = arith.constant 0 : i32
    %c0_i32_1 = arith.constant 0 : i32
    return %c0_i32, %c0_i32_0 : i32, i32
  }
  func.func @transform_4(%arg0: i32) -> (i32, i32) {
    %c0_i32 = arith.constant 0 : i32
    %c0_i32_0 = arith.constant 0 : i32
    %c0_i32_1 = arith.constant 0 : i32
    return %c0_i32, %c0_i32_0 : i32, i32
  }
  func.func @transform_5(%arg0: i32) -> (i32, i32) {
    %c0_i32 = arith.constant 0 : i32
    %c0_i32_0 = arith.constant 0 : i32
    %c0_i32_1 = arith.constant 0 : i32
    return %c0_i32, %c0_i32_0 : i32, i32
  }
  func.func @transform_6(%arg0: i32) -> (i32, i32) {
    %c0_i32 = arith.constant 0 : i32
    %c0_i32_0 = arith.constant 0 : i32
    %c0_i32_1 = arith.constant 0 : i32
    return %c0_i32, %c0_i32_0 : i32, i32
  }
  func.func @transform_7(%arg0: i32) -> (i32, i32) {
    %c0_i32 = arith.constant 0 : i32
    %c0_i32_0 = arith.constant 0 : i32
    %c0_i32_1 = arith.constant 0 : i32
    return %c0_i32, %c0_i32_0 : i32, i32
  }
  func.func @transform_8(%arg0: i32) -> (i32, i32) {
    %c0_i32 = arith.constant 0 : i32
    %c0_i32_0 = arith.constant 0 : i32
    %c0_i32_1 = arith.constant 0 : i32
    return %c0_i32, %c0_i32_0 : i32, i32
  }
  func.func @transform_9(%arg0: i32) -> (i32, i32) {
    %c0_i32 = arith.constant 0 : i32
    %c0_i32_0 = arith.constant 0 : i32
    return %arg0, %c0_i32 : i32, i32
  }
}

</mosaic_0001>

<bundles_post_ra>
// kernel: lifestyle_nn_forward.1
= control target key start
LH: loop header
LB: loop body
LE: loop exit
PB: predicated region body
PF: predicated region fallthrough
CT: control target
= control target key end

     0   :  { %v743_v2 = vmov 0   ;;  %vm72_vm0 = vcmask 261120   ;;  %s941_s0 = inlined_call_operand.vmem [shape: f32[8,32], index: 0, kind: input, shape index: {}]   ;;  %s942_s1 = inlined_call_operand.vmem [shape: bf16[32,256], index: 1, kind: input, shape index: {}]   ;;  %s943_s2 = inlined_call_operand.vmem [shape: f32[1,256], index: 2, kind: input, shape index: {}]   ;;  %s944_s3 = inlined_call_operand.vmem [shape: bf16[256,128], index: 3, kind: input, shape index: {}]   ;;  %s945_s4 = inlined_call_operand.vmem [shape: f32[1,128], index: 4, kind: input, shape index: {}]   ;;  %s946_s5 = inlined_call_operand.vmem [shape: bf16[128,128], index: 5, kind: input, shape index: {}]   ;;  %s947_s6 = inlined_call_operand.vmem [shape: f32[1,128], index: 6, kind: input, shape index: {}]   ;;  %s948_s7 = inlined_call_operand.vmem [shape: bf16[128,128], index: 7, kind: input, shape index: {}]   ;;  %s949_s8 = inlined_call_operand.vmem [shape: f32[1,128], index: 8, kind: input, shape index: {}]   ;;  %s950_s9 = inlined_call_operand.hbm [shape: f32[8,8], index: 9, kind: output, shape index: {}]  }
   0x1   :  { %v679_v0 = vld [vmem:[%s942_s1 + $0x14] ss:$8 sps:$4 sm:$0xff]   ;;  %v681_v1 = vld [vmem:[%s942_s1 + $0x10] ss:$8 sps:$4 sm:$0xff]   ;;  %108 = vmatprep.mubr.bf16.mxu0 %v743_v2  ;;  %v682_v3 = vld [vmem:[%s942_s1 + $0x4] ss:$8 sps:$4 sm:$0xff]  }
   0x2   :  { %88 = vmatprep.subr.bf16.mxu0 %v679_v0  ;;  %v684_v4 = vld [vmem:[%s942_s1] ss:$8 sps:$4 sm:$0xff]   ;;  %v685_v6 = vld [vmem:[%s944_s3 + $0x78] sm:$0xff]   ;;  %v687_v8 = vld [vmem:[%s944_s3 + $0x70] sm:$0xff]  }
   0x3   :  { %v34_v5 = vld [vmem:[%s941_s0] sm:$0xff]  ;;  %89 = vmatpush1.bf16.msra.mxu0 %v681_v1  ;;  %v686_v7 = vld [vmem:[%s944_s3 + $0x38] sm:$0xff]   ;;  %595 = vmatprep.subr.bf16.mxu1 %v685_v6  ;;  %v688_v10 = vld [vmem:[%s944_s3 + $0x30] sm:$0xff]  }
   0x4   :  { %90 = vmatprep.subr.bf16.mxu0 %v682_v3  ;;  %v35_v9 = vpack.c.bf16 %v34_v5, %v34_v5  ;;  %596 = vmatpush3.bf16.msra.mxu1 %v686_v7  ;;  %v689_v11 = vld [vmem:[%s944_s3 + $0x68] sm:$0xff]   ;;  %v691_v13 = vld [vmem:[%s944_s3 + $0x60] sm:$0xff]   ;;  %v693_v15 = vld [vmem:[%s944_s3 + $0x58] sm:$0xff]  }
   0x5   :  { %597 = vmatprep.subr.bf16.mxu1 %v687_v8  ;;  %v690_v12 = vld [vmem:[%s944_s3 + $0x28] sm:$0xff]   ;;  %v692_v14 = vld [vmem:[%s944_s3 + $0x20] sm:$0xff]   ;;  %v694_v16 = vld [vmem:[%s944_s3 + $0x18] sm:$0xff]  }
   0x6   :  { %v695_v17 = vld [vmem:[%s944_s3 + $0x50] sm:$0xff]  }
   0x7   :  { %91 = vmatpush1.bf16.msra.mxu0 %v684_v4 }
   0x8   :  { %598 = vmatpush3.bf16.msra.mxu1 %v688_v10 }
   0x9   :  { %599 = vmatprep.subr.bf16.mxu1 %v689_v11 }
   0xa   :  { %559 = vmatmul.mubr.msk.bf16.vlgmr.msra.gmra.mxu0 %vm72_vm0, %v35_v9 }
   0xc   :  { %600 = vmatpush3.bf16.msra.mxu1 %v690_v12 }
   0xd   :  { %601 = vmatprep.subr.bf16.mxu1 %v691_v13 }
  0x10   :  { %602 = vmatpush3.bf16.msra.mxu1 %v692_v14 }
  0x11   :  { %603 = vmatprep.subr.bf16.mxu1 %v693_v15 }
  0x14   :  { %604 = vmatpush3.bf16.msra.mxu1 %v694_v16 }
  0x15   :  { %605 = vmatprep.subr.bf16.mxu1 %v695_v17 }
  0x16   :  { %14 = vsyncpa [#allocation3], 0  ;;  %v696_v18 = vld [vmem:[%s944_s3 + $0x10] sm:$0xff]   ;;  %v697_v19 = vld [vmem:[%s944_s3 + $0x48] sm:$0xff]   ;;  %v744_v24 = vmov 0.0   ;;  %v42_v29 = vlaneseq  ;;  %vm745_vm3 = vmmov 0  }
  0x17   :  { %v698_v20 = vld [vmem:[%s944_s3 + $0x8] sm:$0xff]   ;;  %v699_v21 = vld [vmem:[%s944_s3 + $0x40] sm:$0xff]   ;;  %v701_v23 = vld [vmem:[%s946_s5 + $0x38] sm:$0xff]   ;;  %635 = vmatprep.subr.bf16.mxu0 %v744_v24  ;;  %651 = vmatprep.mubr.msk.bf16.mxu0 %vm745_vm3, %v744_v24  ;;  %vm539_vm6 = vcmask 64512  }
  0x18   :  { %606 = vmatpush3.bf16.msra.mxu1 %v696_v18  ;;  %v700_v22 = vld [vmem:[%s944_s3] sm:$0xff]   ;;  %636 = vmatpush3.bf16.msra.mxu0 %v701_v23  ;;  %v702_v25 = vld [vmem:[%s946_s5 + $0x30] sm:$0xff]   ;;  %v703_v26 = vld [vmem:[%s946_s5 + $0x28] sm:$0xff]   ;;  %v43_v30 = vshrl.u32 %v42_v29, 7 }
  0x19   :  { %607 = vmatprep.subr.bf16.mxu1 %v697_v19  ;;  %637 = vmatprep.subr.bf16.mxu0 %v744_v24  ;;  %v704_v27 = vld [vmem:[%s946_s5 + $0x20] sm:$0xff]   ;;  %v705_v28 = vld [vmem:[%s946_s5 + $0x18] sm:$0xff]   ;;  %v706_v48 = vld [vmem:[%s946_s5 + $0x10] sm:$0xff]  }
  0x1a   :  { %v44_v31 = vsub.s32 0, %v43_v30  ;;  %v40_v32 = vld [vmem:[%s943_s2] sm:$0x3]  ;;  %v48_v33 = vsub.s32 1, %v43_v30  ;;  %v707_v49 = vld [vmem:[%s946_s5 + $0x8] sm:$0xff]   ;;  %v709_v51 = vld [vmem:[%s948_s7 + $0x38] sm:$0xff]  }
  0x1b   :  { %v708_v50 = vld [vmem:[%s946_s5] sm:$0xff]   ;;  %v710_v52 = vld [vmem:[%s948_s7 + $0x30] sm:$0xff]   ;;  %v711_v53 = vld [vmem:[%s948_s7 + $0x28] sm:$0xff]  }
  0x1c   :  { %608 = vmatpush3.bf16.msra.mxu1 %v698_v20  ;;  %638 = vmatpush3.bf16.msra.mxu0 %v702_v25  ;;  %v45_v34 = vrot.slane %v40_v32, %v44_v31  ;;  %v49_v35 = vrot.slane %v40_v32, %v48_v33  ;;  %v712_v54 = vld [vmem:[%s948_s7 + $0x20] sm:$0xff]   ;;  %v713_v55 = vld [vmem:[%s948_s7 + $0x18] sm:$0xff]   ;;  %v714_v56 = vld [vmem:[%s948_s7 + $0x10] sm:$0xff]  }
  0x1d   :  { %609 = vmatprep.subr.bf16.mxu1 %v699_v21  ;;  %639 = vmatprep.subr.bf16.mxu0 %v744_v24  ;;  %v560_v58 = vld [vmem:[%s945_s4] ss:$0 sm:$0xff]  ;;  %v715_v3 = vld [vmem:[%s948_s7 + $0x8] sm:$0xff]  }
  0x1e   :  { %v716_v4 = vld [vmem:[%s948_s7] sm:$0xff]  }
  0x1f   :  { %v577_v5 = vld [vmem:[%s947_s6] ss:$0 sm:$0xff]  ;;  %s746_s6 = smov [#allocation2]  }
  0x20   :  { %610 = vmatpush3.bf16.msra.mxu1 %v700_v22  ;;  %640 = vmatpush3.bf16.msra.mxu0 %v703_v26  ;;  %v586_v14 = vld [vmem:[%s949_s8] ss:$0 sm:$0xff]  ;;  %s547_s7 = sshll.u32 %s746_s6, 4  ;;  %s548_s7 = int_to_ptr.vmem [resolvable:$true] %s547_s7 }
  0x21   :  { %655 = vmatprep.subr.bf16.mxu1 %v744_v24  ;;  %641 = vmatprep.subr.bf16.mxu0 %v744_v24  ;;  %s721_s8 = scalar_lea.vmem %s548_s7, 128  ;;  %p726_p1 = scmp.lt.s32.totalorder %s548_s7, %s548_s7 }
  0x22   :  { %p722_p0 = scmp.ne.s32.totalorder %s548_s7, %s721_s8  ;;  %p727_p2 = scmp.lt.s32.totalorder %s721_s8, %s721_s8 }
  0x24   :  { %642 = vmatpush3.bf16.msra.mxu0 %v704_v27  ;;  %p728_p3 = por %p727_p2, %p726_p1 }
  0x25   :  { %643 = vmatprep.subr.bf16.mxu0 %v744_v24 }
  0x26   :  { %p729_p4 = pnand %p728_p3, %p722_p0 }
  0x28   :  { %644 = vmatpush3.bf16.msra.mxu0 %v705_v28 }
  0x29   :  { %645 = vmatprep.subr.bf16.mxu0 %v744_v24 }
  0x2c   :  { %646 = vmatpush3.bf16.msra.mxu0 %v706_v48 }
  0x2d   :  { %647 = vmatprep.subr.bf16.mxu0 %v744_v24 }
  0x30   :  { %648 = vmatpush3.bf16.msra.mxu0 %v707_v49 }
  0x31   :  { %649 = vmatprep.subr.bf16.mxu0 %v744_v24 }
  0x34   :  { %650 = vmatpush3.bf16.msra.mxu0 %v708_v50 }
  0xca   :  { %v110_v36 = vpop.f32.mrf.mxu0 }
  0xcb   :  { %v111_v37 = vadd.f32 %v110_v36, %v45_v34 }
  0xcc   :  { %v112_v38 = vpop.f32.mrf.mxu0 }
  0xcd   :  { %vm117_vm1 = vcmp.ge.f32.partialorder %v111_v37, 0.0  ;;  %v119_v39 = vmul.f32 0.01, %v111_v37  ;;  %v113_v40 = vadd.f32 %v112_v38, %v49_v35 }
  0xce   :  { %v114_v41 = vpop.f32.mrf.mxu0 }
  0xcf   :  { %vm118_vm2 = vcmp.ge.f32.partialorder %v113_v40, 0.0  ;;  %v120_v42 = vmul.f32 0.01, %v113_v40  ;;  %v121_v44 = vsel %vm117_vm1, %v111_v37, %v119_v39 }
  0xd0   :  { %v115_v43 = vpop.f32.mrf.mxu0  ;;  %v123_v47 = vpack.c.bf16 %v121_v44, %v121_v44 }
  0xd1   :  { %v122_v45 = vsel %vm118_vm2, %v113_v40, %v120_v42 }
  0xd2   :  { %v124_v46 = vpack.c.bf16 %v122_v45, %v122_v45 }
  0xd4   :  { %292 = vmatprep.mubr.bf16.mxu1 %v124_v46 }
  0xd5   :  { %293 = vmatmul.mubr.bf16.vlgmr.msra.gmra.mxu1 %v123_v47 }
  0xd6   :  { %671 = vmatprep.mubr.msk.bf16.mxu1 %vm745_vm3, %v744_v24  ;;  %656 = vmatpush3.bf16.msra.mxu1 %v709_v51 }
  0xd7   :  { %657 = vmatprep.subr.bf16.mxu1 %v744_v24 }
  0xda   :  { %658 = vmatpush3.bf16.msra.mxu1 %v710_v52 }
  0xdb   :  { %659 = vmatprep.subr.bf16.mxu1 %v744_v24 }
  0xde   :  { %660 = vmatpush3.bf16.msra.mxu1 %v711_v53 }
  0xdf   :  { %661 = vmatprep.subr.bf16.mxu1 %v744_v24 }
  0xe2   :  { %662 = vmatpush3.bf16.msra.mxu1 %v712_v54 }
  0xe3   :  { %663 = vmatprep.subr.bf16.mxu1 %v744_v24 }
  0xe6   :  { %664 = vmatpush3.bf16.msra.mxu1 %v713_v55 }
  0xe7   :  { %665 = vmatprep.subr.bf16.mxu1 %v744_v24 }
  0xea   :  { %666 = vmatpush3.bf16.msra.mxu1 %v714_v56 }
  0xeb   :  { %667 = vmatprep.subr.bf16.mxu1 %v744_v24 }
  0xee   :  { %668 = vmatpush3.bf16.msra.mxu1 %v715_v3 }
  0xef   :  { %669 = vmatprep.subr.bf16.mxu1 %v744_v24 }
  0xf2   :  { %670 = vmatpush3.bf16.msra.mxu1 %v716_v4 }
 0x195   :  { %v611_v57 = vpop.f32.mrf.mxu1 }
 0x197   :  { %v612_v59 = vpop.f32.mrf.mxu1 }
 0x198   :  { %v613_v60 = vadd.f32 %v612_v59, %v611_v57 }
 0x199   :  { %v614_v61 = vpop.f32.mrf.mxu1 }
 0x19a   :  { %v295_v62 = vadd.f32 %v613_v60, %v560_v58 }
 0x19b   :  { %v615_v63 = vpop.f32.mrf.mxu1 }
 0x19c   :  { %vm300_vm4 = vcmp.ge.f32.partialorder %v295_v62, 0.0  ;;  %v301_v0 = vmul.f32 0.01, %v295_v62 }
 0x19e   :  { %v302_v1 = vsel %vm300_vm4, %v295_v62, %v301_v0 }
 0x19f   :  { %v303_v2 = vpack.c.bf16 %v302_v1, %v302_v1 }
 0x1a1   :  { %652 = vmatmul.mubr.bf16.vlgmr.msra.gmra.mxu0 %v303_v2 }
 0x261   :  { %v409_v6 = vpop.f32.mrf.mxu0 }
 0x262   :  { %v410_v7 = vadd.f32 %v577_v5, %v409_v6 }
 0x263   :  { %v653_v8 = vpop.f32.mrf.mxu0 }
 0x264   :  { %vm415_vm5 = vcmp.ge.f32.partialorder %v410_v7, 0.0  ;;  %v416_v9 = vmul.f32 0.01, %v410_v7 }
 0x265   :  { %v412_v10 = vpop.f32.mrf.mxu0 }
 0x266   :  { %v417_v11 = vsel %vm415_vm5, %v410_v7, %v416_v9 }
 0x267   :  { %v418_v12 = vpack.c.bf16 %v417_v11, %v417_v11  ;;  %v654_v13 = vpop.f32.mrf.mxu0 }
 0x269   :  { %672 = vmatmul.mubr.bf16.vlgmr.msra.gmra.mxu1 %v418_v12 }
 0x329   :  { %v524_v15 = vpop.f32.mrf.mxu1 }
 0x32a   :  { %v525_v16 = vadd.f32 %v586_v14, %v524_v15 }
 0x32b   :  { %v673_v17 = vpop.f32.mrf.mxu1 }
 0x32c   :  { %530 = vmax.xlane.f32.xlu0 %v525_v16 }
 0x32d   :  { %v527_v18 = vpop.f32.mrf.mxu1 }
 0x32f   :  { %v674_v19 = vpop.f32.mrf.mxu1 }
 0x3b5   :  { %v531_v20 = vpop.xlane.xlu0 %530 }
 0x3b6   :  { %v532_v21 = vsub.f32 %v525_v16, %v531_v20 }
 0x3b8   :  { %v533_v22 = vmul.f32 1.442695, %v532_v21 }
 0x3ba   :  { %717 = vpow2.f32 %v533_v22 }
 0x3c7   :  { %v718_v23 = vpop.eup %717 }
 0x3c8   :  { %535 = vadd.xlane.f32.xlu0 %v718_v23 }
 0x451   :  { %v536_v24 = vpop.xlane.xlu0 %535 }
 0x452   :  { %719 = vrcp.f32 %v536_v24 }
 0x45f   :  { %v720_v25 = vpop.eup %719 }
 0x460   :  { %v538_v26 = vmul.f32 %v720_v25, %v718_v23 }
 0x462   :  { %540 = vst.msk [vmem:[#allocation2] sm:$0xff] %vm539_vm6, %v538_v26 }
 0x463   :  { %732 = shalt.err (!%p729_p4)
}
 0x464   :  { %550 = dma.vmem_to_hbm [thread:$0]  %s548_s7, 128, %s950_s9, [#allocation3]  }
 0x465   :  { %741 = dma.done.wait [#allocation3], 128  }
 0x466   :  { %742 = vsyncadd [#allocation3], 4294967168 }
 0x467   :  { %554 = vsyncpa [#allocation3], 1 }

</bundles_post_ra>
